<compile_context>
chip_gen: v5e
topology: v5e:2x2
jax: 0.10.0
libtpu: 0.0.40
codegen_flags: <defaults>
</compile_context>

<pallas_src>
import math

import jax
import jax.numpy as jnp
from jax.experimental import pallas as pl
from jax.experimental.pallas import tpu as pltpu


_INV_SQRT2 = 0.7071067811865476


def _erf_approx(x):
    """Abramowitz & Stegun 7.1.26 rational erf approximation (|err| <= ~1.5e-7).

    Uses only exp/abs/where/div so it lowers cleanly on all TPU generations
    (exp and the reciprocal go to the EUP slot; the polynomial is VPU filler).
    """
    p = 0.3275911
    a1, a2, a3, a4, a5 = (0.254829592, -0.284496736, 1.421413741,
                          -1.453152027, 1.061405429)
    s = jnp.where(x >= 0.0, 1.0, -1.0)
    ax = jnp.abs(x)
    t = 1.0 / (1.0 + p * ax)
    poly = ((((a5 * t + a4) * t + a3) * t + a2) * t + a1) * t
    return s * (1.0 - poly * jnp.exp(-ax * ax))


def _gelu_exact(x):
    return 0.5 * x * (1.0 + _erf_approx(x * _INV_SQRT2))


def _tfa_kernel(sa_ref, x_ref, w_ref, b_ref, scale_ref, shift_ref, o_ref):
    # sa_ref   : SMEM (2,)           [w_avg, w_max] of the SpatialAttention 1x1 conv
    # x_ref    : VMEM (C_in, T)      channels on sublanes, pixels on lanes
    # w_ref    : VMEM (C_out, C_in)  1x1 conv weight
    # b_ref    : VMEM (C_out, 1)     conv bias
    # scale_ref: VMEM (C_out, 1)     folded BatchNorm scale  (gamma / sqrt(var+eps))
    # shift_ref: VMEM (C_out, 1)     folded BatchNorm shift  (beta - mean*scale)
    # o_ref    : VMEM (C_out, T)     lane-dense output tile (NCHW order)
    y = jnp.dot(w_ref[...], x_ref[...],
                preferred_element_type=jnp.float32) + b_ref[...]      # (C_out, T)

    avg = jnp.mean(y, axis=0, keepdims=True)                          # (1, T)  sublane reduce
    mx = jnp.max(y, axis=0, keepdims=True)                            # (1, T)  sublane reduce
    attn = jax.nn.sigmoid(sa_ref[0] * avg + sa_ref[1] * mx)           # (1, T)  EUP

    z = y * (1.0 + attn)                                              # attended + residual
    z = z * scale_ref[...] + shift_ref[...]                           # BatchNorm (inference)
    o_ref[...] = _gelu_exact(z).astype(o_ref.dtype)                   # GELU; Dropout = identity


def tfa_forward(x, conv_w, conv_b, sa_w, bn_gamma, bn_beta, bn_mean, bn_var,
                *, eps=1e-5, max_tile_hw=4096):
    """
    x:        [B, C_in, H, W]  (NCHW, matches PyTorch)
    conv_w:   [C_out, C_in]    (1x1 conv weight squeezed)
    conv_b:   [C_out]
    sa_w:     [2]              ([w_avg, w_max] of SpatialAttention's 1x1 conv)
    bn_*:     [C_out]          BatchNorm2d affine + running statistics
    returns   [B, C_out, H, W]
    """
    B, C_in, H, W = x.shape
    C_out = conv_w.shape[0]
    HW = H * W

    # One big lane-dense tile per step: whole image plane if small, else a multiple
    # of 128 lanes (partial edge block handled by cdiv grid — no pad/slice copies).
    tile_hw = HW if HW <= max_tile_hw else max_tile_hw
    grid = (B, pl.cdiv(HW, tile_hw))

    x3 = x.reshape(B, C_in, HW)              # free reshape, NCHW-contiguous
    w = conv_w.astype(jnp.float32)
    b = conv_b.astype(jnp.float32).reshape(C_out, 1)
    inv_std = jax.lax.rsqrt(bn_var.astype(jnp.float32) + eps)
    g = bn_gamma.astype(jnp.float32)
    scale = (g * inv_std).reshape(C_out, 1)
    shift = (bn_beta.astype(jnp.float32)
             - bn_mean.astype(jnp.float32) * g * inv_std).reshape(C_out, 1)

    dsize = jnp.dtype(x.dtype).itemsize
    cost = pl.CostEstimate(
        flops=2 * B * HW * C_in * C_out,
        transcendentals=3 * B * HW,                       # sigmoid + erf(exp) + exp
        bytes_accessed=B * HW * (C_in + C_out) * dsize)

    out = pl.pallas_call(
        _tfa_kernel,
        out_shape=jax.ShapeDtypeStruct((B, C_out, HW), x.dtype),
        grid_spec=pltpu.PrefetchScalarGridSpec(
            num_scalar_prefetch=1,                        # sa_w -> SMEM scalars
            grid=grid,
            in_specs=[
                pl.BlockSpec((None, C_in, tile_hw), lambda bb, j, sa: (bb, 0, j)),
                pl.BlockSpec((C_out, C_in), lambda bb, j, sa: (0, 0)),
                pl.BlockSpec((C_out, 1), lambda bb, j, sa: (0, 0)),
                pl.BlockSpec((C_out, 1), lambda bb, j, sa: (0, 0)),
                pl.BlockSpec((C_out, 1), lambda bb, j, sa: (0, 0)),
            ],
            out_specs=pl.BlockSpec((None, C_out, tile_hw),
                                   lambda bb, j, sa: (bb, 0, j)),
        ),
        compiler_params=pltpu.CompilerParams(
            dimension_semantics=("parallel", "parallel")),
        cost_estimate=cost,
    )(sa_w.astype(jnp.float32), x3, w, b, scale, shift)

    return out.reshape(B, C_out, H, W)


def _reference(x, conv_w, conv_b, sa_w, bn_gamma, bn_beta, bn_mean, bn_var, eps=1e-5):
    # pure-JAX reference of the PyTorch TFA forward (eval mode), NCHW
    y = jnp.einsum("bchw,oc->bohw", x, conv_w) + conv_b[None, :, None, None]
    avg = jnp.mean(y, axis=1, keepdims=True)
    mx = jnp.max(y, axis=1, keepdims=True)
    attn = jax.nn.sigmoid(sa_w[0] * avg + sa_w[1] * mx)
    z = y * attn + y
    z = ((z - bn_mean[None, :, None, None])
         * jax.lax.rsqrt(bn_var[None, :, None, None] + eps)
         * bn_gamma[None, :, None, None] + bn_beta[None, :, None, None])
    return 0.5 * z * (1.0 + jax.scipy.special.erf(z * _INV_SQRT2))   # exact GELU


if __name__ == "__main__":
    key = jax.random.PRNGKey(0)
    k_x, k_w, k_b, k_sa, k_g, k_be, k_m, k_v = jax.random.split(key, 8)

    B, C_in, C_out, H, W = 2, 4, 8, 16, 16

    x = jax.random.normal(k_x, (B, C_in, H, W), dtype=jnp.float32)
    conv_w = jax.random.normal(k_w, (C_out, C_in), dtype=jnp.float32) / math.sqrt(C_in)
    conv_b = jax.random.normal(k_b, (C_out,), dtype=jnp.float32) * 0.1
    sa_w = jax.random.normal(k_sa, (2,), dtype=jnp.float32) / math.sqrt(2.0)
    bn_gamma = 1.0 + 0.1 * jax.random.normal(k_g, (C_out,), dtype=jnp.float32)
    bn_beta = 0.1 * jax.random.normal(k_be, (C_out,), dtype=jnp.float32)
    bn_mean = 0.1 * jax.random.normal(k_m, (C_out,), dtype=jnp.float32)
    bn_var = jnp.abs(1.0 + 0.1 * jax.random.normal(k_v, (C_out,), dtype=jnp.float32))

    out = tfa_forward(x, conv_w, conv_b, sa_w, bn_gamma, bn_beta, bn_mean, bn_var)
    out = jax.block_until_ready(out)

    ref = _reference(x, conv_w, conv_b, sa_w, bn_gamma, bn_beta, bn_mean, bn_var)
    assert out.shape == (B, C_out, H, W)
    err = jnp.max(jnp.abs(out - ref))
    assert jnp.allclose(out, ref, atol=2e-5, rtol=1e-4), f"mismatch vs reference: {err}"

    print("KERNEL_OK")
</pallas_src>

<mosaic_0001>
module attributes {stable_mosaic.version = 11 : i64} {
  func.func @_tfa_kernel(%arg0: i32, %arg1: i32, %arg2: memref<2xf32, #tpu.memory_space<smem>>, %arg3: memref<1x4x256xf32, #tpu.memory_space<vmem>>, %arg4: memref<8x4xf32, #tpu.memory_space<vmem>>, %arg5: memref<8x1xf32, #tpu.memory_space<vmem>>, %arg6: memref<8x1xf32, #tpu.memory_space<vmem>>, %arg7: memref<8x1xf32, #tpu.memory_space<vmem>>, %arg8: memref<1x8x256xf32, #tpu.memory_space<vmem>>) attributes {dimension_semantics = [#tpu.dimension_semantics<parallel>, #tpu.dimension_semantics<parallel>], iteration_bounds = array<i64: 2, 1>, scalar_prefetch = 1 : i64, scratch_operands = 0 : i64, tpu.core_type = #tpu.core_type<tc>, window_params = [{transform_indices = @transform_0, window_bounds = array<i64: 1, 4, 256>}, {pipeline_mode = #tpu.pipeline_mode<synchronous>, transform_indices = @transform_1, window_bounds = array<i64: 8, 4>}, {pipeline_mode = #tpu.pipeline_mode<synchronous>, transform_indices = @transform_2, window_bounds = array<i64: 8, 1>}, {pipeline_mode = #tpu.pipeline_mode<synchronous>, transform_indices = @transform_3, window_bounds = array<i64: 8, 1>}, {pipeline_mode = #tpu.pipeline_mode<synchronous>, transform_indices = @transform_4, window_bounds = array<i64: 8, 1>}, {transform_indices = @transform_5, window_bounds = array<i64: 1, 8, 256>}]} {
    %c0 = arith.constant 0 : index
    %c0_0 = arith.constant 0 : index
    %0 = vector.load %arg4[%c0, %c0_0] : memref<8x4xf32, #tpu.memory_space<vmem>>, vector<8x4xf32>
    %c0_1 = arith.constant 0 : index
    %c0_2 = arith.constant 0 : index
    %c0_3 = arith.constant 0 : index
    %1 = vector.load %arg3[%c0_1, %c0_2, %c0_3] : memref<1x4x256xf32, #tpu.memory_space<vmem>>, vector<1x4x256xf32>
    %2 = vector.shape_cast %1 : vector<1x4x256xf32> to vector<4x256xf32>
    %cst = arith.constant dense<0.000000e+00> : vector<8x256xf32>
    %3 = tpu.matmul %0, %2, %cst {dimension_numbers = #tpu.dot_dimension_numbers<[1], [0], [0], [1], [0, 0, 1, 1], [], []>} : vector<8x4xf32>, vector<4x256xf32>, vector<8x256xf32> -> vector<8x256xf32>
    %c0_4 = arith.constant 0 : index
    %c0_5 = arith.constant 0 : index
    %4 = vector.load %arg5[%c0_4, %c0_5] : memref<8x1xf32, #tpu.memory_space<vmem>>, vector<8x1xf32>
    %5 = vector.broadcast %4 : vector<8x1xf32> to vector<8x256xf32>
    %6 = arith.addf %3, %5 : vector<8x256xf32>
    %cst_6 = arith.constant dense<0.000000e+00> : vector<256xf32>
    %7 = vector.multi_reduction <add>, %6, %cst_6 [0] : vector<8x256xf32> to vector<256xf32>
    %8 = vector.shape_cast %7 : vector<256xf32> to vector<1x256xf32>
    %cst_7 = arith.constant 8.000000e+00 : f32
    %9 = vector.broadcast %cst_7 : f32 to vector<1x256xf32>
    %10 = arith.divf %8, %9 : vector<1x256xf32>
    %cst_8 = arith.constant dense<0xFF800000> : vector<256xf32>
    %11 = vector.multi_reduction <maximumf>, %6, %cst_8 [0] : vector<8x256xf32> to vector<256xf32>
    %12 = vector.shape_cast %11 : vector<256xf32> to vector<1x256xf32>
    %c0_9 = arith.constant 0 : index
    %13 = memref.load %arg2[%c0_9] : memref<2xf32, #tpu.memory_space<smem>>
    %14 = vector.broadcast %13 : f32 to vector<1x256xf32>
    %15 = arith.mulf %14, %10 : vector<1x256xf32>
    %c1 = arith.constant 1 : index
    %16 = memref.load %arg2[%c1] : memref<2xf32, #tpu.memory_space<smem>>
    %17 = vector.broadcast %16 : f32 to vector<1x256xf32>
    %18 = arith.mulf %17, %12 : vector<1x256xf32>
    %19 = arith.addf %15, %18 : vector<1x256xf32>
    %20 = arith.negf %19 : vector<1x256xf32>
    %21 = math.exp %20 : vector<1x256xf32>
    %cst_10 = arith.constant 1.000000e+00 : f32
    %22 = vector.broadcast %cst_10 : f32 to vector<1x256xf32>
    %23 = arith.addf %22, %21 : vector<1x256xf32>
    %24 = arith.divf %22, %23 : vector<1x256xf32>
    %cst_11 = arith.constant 1.000000e+00 : f32
    %25 = vector.broadcast %cst_11 : f32 to vector<1x256xf32>
    %26 = arith.addf %25, %24 : vector<1x256xf32>
    %27 = vector.broadcast %26 : vector<1x256xf32> to vector<8x256xf32>
    %28 = arith.mulf %6, %27 : vector<8x256xf32>
    %c0_12 = arith.constant 0 : index
    %c0_13 = arith.constant 0 : index
    %29 = vector.load %arg6[%c0_12, %c0_13] : memref<8x1xf32, #tpu.memory_space<vmem>>, vector<8x1xf32>
    %30 = vector.broadcast %29 : vector<8x1xf32> to vector<8x256xf32>
    %31 = arith.mulf %28, %30 : vector<8x256xf32>
    %c0_14 = arith.constant 0 : index
    %c0_15 = arith.constant 0 : index
    %32 = vector.load %arg7[%c0_14, %c0_15] : memref<8x1xf32, #tpu.memory_space<vmem>>, vector<8x1xf32>
    %33 = vector.broadcast %32 : vector<8x1xf32> to vector<8x256xf32>
    %34 = arith.addf %31, %33 : vector<8x256xf32>
    %cst_16 = arith.constant 5.000000e-01 : f32
    %35 = vector.broadcast %cst_16 : f32 to vector<8x256xf32>
    %36 = arith.mulf %35, %34 : vector<8x256xf32>
    %cst_17 = arith.constant 0.707106769 : f32
    %37 = vector.broadcast %cst_17 : f32 to vector<8x256xf32>
    %38 = arith.mulf %34, %37 : vector<8x256xf32>
    %cst_18 = arith.constant 0.000000e+00 : f32
    %39 = vector.broadcast %cst_18 : f32 to vector<8x256xf32>
    %40 = arith.cmpf oge, %38, %39 : vector<8x256xf32>
    %cst_19 = arith.constant 1.000000e+00 : f32
    %cst_20 = arith.constant -1.000000e+00 : f32
    %41 = vector.broadcast %cst_19 : f32 to vector<8x256xf32>
    %42 = vector.broadcast %cst_20 : f32 to vector<8x256xf32>
    %43 = arith.select %40, %41, %42 : vector<8x256xi1>, vector<8x256xf32>
    %44 = math.absf %38 : vector<8x256xf32>
    %cst_21 = arith.constant 0.327591091 : f32
    %45 = vector.broadcast %cst_21 : f32 to vector<8x256xf32>
    %46 = arith.mulf %45, %44 : vector<8x256xf32>
    %cst_22 = arith.constant 1.000000e+00 : f32
    %47 = vector.broadcast %cst_22 : f32 to vector<8x256xf32>
    %48 = arith.addf %47, %46 : vector<8x256xf32>
    %cst_23 = arith.constant 1.000000e+00 : f32
    %49 = vector.broadcast %cst_23 : f32 to vector<8x256xf32>
    %50 = arith.divf %49, %48 : vector<8x256xf32>
    %cst_24 = arith.constant 1.06140542 : f32
    %51 = vector.broadcast %cst_24 : f32 to vector<8x256xf32>
    %52 = arith.mulf %51, %50 : vector<8x256xf32>
    %cst_25 = arith.constant -1.45315206 : f32
    %53 = vector.broadcast %cst_25 : f32 to vector<8x256xf32>
    %54 = arith.addf %52, %53 : vector<8x256xf32>
    %55 = arith.mulf %54, %50 : vector<8x256xf32>
    %cst_26 = arith.constant 1.42141378 : f32
    %56 = vector.broadcast %cst_26 : f32 to vector<8x256xf32>
    %57 = arith.addf %55, %56 : vector<8x256xf32>
    %58 = arith.mulf %57, %50 : vector<8x256xf32>
    %cst_27 = arith.constant -0.284496725 : f32
    %59 = vector.broadcast %cst_27 : f32 to vector<8x256xf32>
    %60 = arith.addf %58, %59 : vector<8x256xf32>
    %61 = arith.mulf %60, %50 : vector<8x256xf32>
    %cst_28 = arith.constant 0.254829586 : f32
    %62 = vector.broadcast %cst_28 : f32 to vector<8x256xf32>
    %63 = arith.addf %61, %62 : vector<8x256xf32>
    %64 = arith.mulf %63, %50 : vector<8x256xf32>
    %cst_29 = arith.constant 0.000000e+00 : f32
    %65 = vector.broadcast %cst_29 : f32 to vector<8x256xf32>
    %66 = arith.subf %65, %44 : vector<8x256xf32>
    %67 = arith.mulf %66, %44 : vector<8x256xf32>
    %68 = math.exp %67 : vector<8x256xf32>
    %69 = arith.mulf %64, %68 : vector<8x256xf32>
    %cst_30 = arith.constant 1.000000e+00 : f32
    %70 = vector.broadcast %cst_30 : f32 to vector<8x256xf32>
    %71 = arith.subf %70, %69 : vector<8x256xf32>
    %72 = arith.mulf %43, %71 : vector<8x256xf32>
    %cst_31 = arith.constant 1.000000e+00 : f32
    %73 = vector.broadcast %cst_31 : f32 to vector<8x256xf32>
    %74 = arith.addf %73, %72 : vector<8x256xf32>
    %75 = arith.mulf %36, %74 : vector<8x256xf32>
    %c0_32 = arith.constant 0 : index
    %c0_33 = arith.constant 0 : index
    %c0_34 = arith.constant 0 : index
    %76 = vector.load %arg8[%c0_32, %c0_33, %c0_34] : memref<1x8x256xf32, #tpu.memory_space<vmem>>, vector<1x8x256xf32>
    %77 = vector.shape_cast %76 : vector<1x8x256xf32> to vector<8x256xf32>
    %78 = vector.shape_cast %75 : vector<8x256xf32> to vector<1x8x256xf32>
    tpu.vector_store %arg8[%c0_32, %c0_33, %c0_34], %78 {strides = array<i32>} : memref<1x8x256xf32, #tpu.memory_space<vmem>>, vector<1x8x256xf32>,
    return
  }
  func.func @transform_0(%arg0: i32, %arg1: i32, %arg2: memref<2xf32, #tpu.memory_space<smem>>) -> (i32, i32, i32) {
    %c0_i32 = arith.constant 0 : i32
    %c0_i32_0 = arith.constant 0 : i32
    return %arg0, %c0_i32, %arg1 : i32, i32, i32
  }
  func.func @transform_1(%arg0: i32, %arg1: i32, %arg2: memref<2xf32, #tpu.memory_space<smem>>) -> (i32, i32) {
    %c0_i32 = arith.constant 0 : i32
    %c0_i32_0 = arith.constant 0 : i32
    %c0_i32_1 = arith.constant 0 : i32
    return %c0_i32, %c0_i32_0 : i32, i32
  }
  func.func @transform_2(%arg0: i32, %arg1: i32, %arg2: memref<2xf32, #tpu.memory_space<smem>>) -> (i32, i32) {
    %c0_i32 = arith.constant 0 : i32
    %c0_i32_0 = arith.constant 0 : i32
    %c0_i32_1 = arith.constant 0 : i32
    return %c0_i32, %c0_i32_0 : i32, i32
  }
  func.func @transform_3(%arg0: i32, %arg1: i32, %arg2: memref<2xf32, #tpu.memory_space<smem>>) -> (i32, i32) {
    %c0_i32 = arith.constant 0 : i32
    %c0_i32_0 = arith.constant 0 : i32
    %c0_i32_1 = arith.constant 0 : i32
    return %c0_i32, %c0_i32_0 : i32, i32
  }
  func.func @transform_4(%arg0: i32, %arg1: i32, %arg2: memref<2xf32, #tpu.memory_space<smem>>) -> (i32, i32) {
    %c0_i32 = arith.constant 0 : i32
    %c0_i32_0 = arith.constant 0 : i32
    %c0_i32_1 = arith.constant 0 : i32
    return %c0_i32, %c0_i32_0 : i32, i32
  }
  func.func @transform_5(%arg0: i32, %arg1: i32, %arg2: memref<2xf32, #tpu.memory_space<smem>>) -> (i32, i32, i32) {
    %c0_i32 = arith.constant 0 : i32
    %c0_i32_0 = arith.constant 0 : i32
    return %arg0, %c0_i32, %arg1 : i32, i32, i32
  }
}

</mosaic_0001>

<bundles_post_ra>
// kernel: tpu_custom_call.1
= control target key start
LH: loop header
LB: loop body
LE: loop exit
PB: predicated region body
PF: predicated region fallthrough
CT: control target
= control target key end

     0   :  { %s797_s24 = smov [#allocation3]   ;;  %s980_s0 = inlined_call_operand.vmem [shape: f32[2], index: 0, kind: input, shape index: {}]   ;;  %s981_s1 = inlined_call_operand.vmem [shape: f32[2,4,256], index: 1, kind: input, shape index: {}]   ;;  %s982_s2 = inlined_call_operand.vmem [shape: f32[8,4], index: 2, kind: input, shape index: {}]   ;;  %s983_s3 = inlined_call_operand.vmem [shape: f32[8,1], index: 3, kind: input, shape index: {}]   ;;  %s984_s4 = inlined_call_operand.vmem [shape: f32[8,1], index: 4, kind: input, shape index: {}]   ;;  %s985_s5 = inlined_call_operand.vmem [shape: f32[8,1], index: 5, kind: input, shape index: {}]   ;;  %s986_s6 = inlined_call_operand.hbm [shape: f32[2,8,256], index: 6, kind: output, shape index: {}]  }
   0x1   :  { %s12_s23 = sshll.u32 %s980_s0, 4  ;;  %s13_s23 = int_to_ptr.vmem [resolvable:$true] %s12_s23 }
   0x2   :  { %15 = dma.vmem_to_smem %s13_s23, 16, %s797_s24, [#allocation2] }
   0x3   :  { %767 = dma.done.wait [#allocation2], 16 }
   0x4   :  { %768 = vsyncadd [#allocation2], 4294967280 }
   0x5   :  { %18 = sfence }
   0x6   :  { %19 = vsyncpa [#allocation5], 0 }
   0x7   :  { %21 = vsyncpa [#allocation5 + $0x1], 0  ;;  %s839_s25 = smov 0   ;;  %s841_s26 = smov 0  }
   0x8   :  { %s843_s27 = smov 0   ;;  %s845_s28 = smov 0  }
   0x9   :  { %s847_s29 = smov 0   ;;  %s849_s30 = smov 0  }
   0xa LB: > { %s602_s0 = sadd.s32 4294967295, %s795_s30   ;;  %s603_s7 = sadd.s32 4294967294, %s795_s30   ;;  %s795_s30 = sphi %s849_s30, %s27_s30   ;;  %s791_s29 = sphi %s847_s29, %s993_s29   ;;  %s787_s28 = sphi %s845_s28, %s992_s28   ;;  %s783_s27 = sphi %s843_s27, %s991_s27   ;;  %s779_s26 = sphi %s841_s26, %s990_s26   ;;  %s775_s25 = sphi %s839_s25, %s989_s25  }
   0xb   : > { %s39_s8 = sadd.s32 1, %s791_s29  ;;  %s160_s9 = sadd.s32 1, %s783_s27 }
   0xc   : > { %p41_p0 = scmp.ge.s32.totalorder %s39_s8, 2  ;;  %p170_p1 = scmp.ne.s32.totalorder %s783_s27, %s779_s26 }
   0xd   : > { %p171_p2 = scmp.eq.s32.totalorder %s602_s0, 1  ;;  %p176_p3 = scmp.ne.s32.totalorder %s779_s26, %s775_s25 }
   0xe   : > { %s995_s8 = smov (%p41_p0, %s39_s8), 0  ;;  %p177_p5 = scmp.eq.s32.totalorder %s603_s7, 1 }
   0xf   : > { %p879_p4 = por %p171_p2, %p170_p1  ;;  %s155_s11 = ssub.s32 %s791_s29, %s995_s8 }
  0x10   : > { %p606_p6 = scmp.ge.s32.totalorder %s795_s30, 1  ;;  %p158_p7 = scmp.eq.s32.totalorder %s155_s11, 0 }
  0x11   : > { %p886_p8 = por %p177_p5, %p176_p3  ;;  %p220_p9 = scmp.lt.s32.totalorder %s795_s30, 3 }
  0x12   : > { %s892_s13 = scalar_select %p158_p7, %s783_s27, %s160_s9  }
  0x13   : > { %p221_p10 = pnand %p606_p6, %p220_p9 }
  0x14   : > { %p253_p11 = scmp.lt.s32.totalorder (!%p221_p10), %s787_s28, 1  ;;  %s614_s9 = sld [smem:[#allocation3 + $0x1]] (!%p221_p10) }
  0x15   : > { %224 = sbr.rel (%p221_p10) target bundleno = 279 (0x117), region = 40  ;;  %s357_s11 = sld [smem:[#allocation3]] (!%p221_p10) }
  0x16   : > { %s249_s14 = sand.u32 (!%p221_p10), 1, %s779_s26   ;;  %s623_s16 = sshll.u32 (!%p221_p10), %s787_s28, 4 }
  0x17   : > { %s607_s15 = sshll.u32 (!%p221_p10), %s249_s14, 4 }
  0x18   : > { %s251_s20 = scalar_lea.vmem (!%p221_p10), [#allocation4], %s607_s15 }
  0x1a   : > { %v265_v0 = vld [vmem:[%s983_s3] sm:$0xff]  ;;  %v798_v1 = vmov 0   ;;  %s254_s18 = scalar_select %p253_p11, %s787_s28, 1  ;;  %vm279_vm0 = vcmask 1043456   ;;  %vm275_vm1 = vcmask 31744   ;;  %v799_v8 = vmov 8.0  }
  0x1b   : > { %683 = vset.pattern.permute.xlu0 %v798_v1  ;;  %684 = vset.pattern.permute.xlu1 %v798_v1  ;;  %v417_v2 = vld [vmem:[%s985_s5] sm:$0xff]  ;;  %685 = vrcp.f32 %v799_v8  ;;  %v358_v42 = vstv %s357_s11  ;;  %v362_v43 = vstv %s614_s9  ;;  %s523_s28 = sshll.u32 %s251_s20, 4  ;;  %s735_s9 = scalar_lea.hbm %s986_s6, 32  ;;  %s524_s28 = int_to_ptr.vmem [resolvable:$true] %s523_s28 }
  0x1c   : > { %268 = vperm.xlu0 %683, %v265_v0   ;;  %420 = vperm.xlu1 %684, %v417_v2   ;;  %s622_s19 = sshll.u32 %s254_s18, 3  ;;  %v409_v4 = vld [vmem:[%s984_s4] sm:$0xff] }
  0x1d   : > { %s260_s22 = scalar_lea.vmem %s981_s1, %s622_s19  ;;  %v263_v5 = vld [vmem:[%s982_s2] sm:$0xff]  ;;  %s521_s19 = scalar_lea.hbm %s986_s6, %s623_s16 }
  0x1e   : > { %v264_v3 = vld [vmem:[%s260_s22] sm:$0xff]  ;;  %s525_s21 = sshll.u32 %s521_s19, 4  ;;  %s508_s22 = scalar_lea.sflag [#allocation5], %s249_s14  ;;  %s526_s21 = int_to_ptr.hbm [resolvable:$true] %s525_s21 }
  0x1f   : > { %272 = vst [vmem:[#allocation1] ss:$2 sm:$0xff] %v264_v3  ;;  %s729_s23 = sshra.s32 %s526_s21, 4  ;;  %s730_s23 = int_to_ptr.hbm [resolvable:$true] %s729_s23 }
  0x20   : > { %s731_s24 = scalar_lea.hbm %s730_s23, 16  ;;  %p736_p1 = scmp.lt.s32.totalorder %s730_s23, %s986_s6 }
  0x21   : > { %v686_v9 = vpop.eup %685  ;;  %p732_p12 = scmp.ne.s32.totalorder %s730_s23, %s731_s24  ;;  %p737_p2 = scmp.lt.s32.totalorder %s735_s9, %s731_s24 }
  0x22   : > { %v337_v10 = vmul.f32 8.0, %v686_v9  ;;  %vm341_vm2 = vweird.f32 %v686_v9 }
  0x23   : > { %p733_p13 = pnand %p732_p12, %p879_p4  ;;  %p738_p3 = por %p737_p2, %p736_p1 }
  0x24   : > { %412 = vperm.xlu0 %683, %v409_v4   ;;  %v338_v13 = vsub.f32 1.0, %v337_v10 }
  0x25   : > { %p734_p0 = pneg %p733_p13 }
  0x26   : > { %v273_v6 = vld.sshfl [vmem:[#allocation1] sm:$0xff pattern:$0x75316420]  ;;  %v274_v7 = vld.sshfl [vmem:[#allocation1 + $0x8] sm:$0xff pattern:$0x75316420]  ;;  %v339_v19 = vmul.f32 %v686_v9, %v338_v13 }
  0x27   : > { %610 = vmatpush.msk.msra.mxu0 %vm279_vm0, %v273_v6  ;;  %612 = vmatpush.msk.msra.mxu1 %vm279_vm0, %v274_v7  ;;  %p739_p5 = pnand %p738_p3, %p734_p0 }
  0x28   : > { %611 = vmatmul.msk.f32.vlgmr.msra.gmra.mxu0 %vm275_vm1, %v263_v5  ;;  %613 = vmatmul.msk.f32.vlgmr.msra.gmra.mxu1 %vm275_vm1, %v263_v5  ;;  %v340_v28 = vadd.f32 %v686_v9, %v339_v19 }
  0x2a   : > { %v342_v37 = vsel %vm341_vm2, %v686_v9, %v340_v28 }
  0x8e   : > { %v269_v11 = vpop.permute.xlu0 %268 }
  0x96   : > { %v413_v19 = vpop.permute.xlu0 %412 }
  0xa5   : > { %v301_v12 = vpop.f32.mrf.mxu0  ;;  %v321_v14 = vpop.f32.mrf.mxu1 }
  0xa6   : > { %v911_v15 = vadd.f32 %v301_v12, %v269_v11  ;;  %v913_v16 = vadd.f32 %v321_v14, %v269_v11 }
  0xa8   : > { %v324_v17 = vrot.slane %v911_v15, 4  ;;  %v330_v18 = vrot.slane %v913_v16, 4 }
  0xaa   : > { %v325_v20 = vadd.f32 %v324_v17, %v911_v15  ;;  %v346_v21 = vmax.f32 %v911_v15, %v324_v17  ;;  %v331_v22 = vadd.f32 %v330_v18, %v913_v16  ;;  %v352_v23 = vmax.f32 %v913_v16, %v330_v18 }
  0xac   : > { %v326_v24 = vrot.slane %v325_v20, 2  ;;  %v347_v25 = vrot.slane %v346_v21, 2  ;;  %v332_v26 = vrot.slane %v331_v22, 2  ;;  %v353_v27 = vrot.slane %v352_v23, 2 }
  0xae   : > { %v327_v29 = vadd.f32 %v326_v24, %v325_v20  ;;  %v348_v30 = vmax.f32 %v346_v21, %v347_v25  ;;  %v333_v31 = vadd.f32 %v332_v26, %v331_v22  ;;  %v354_v32 = vmax.f32 %v352_v23, %v353_v27  ;;  %v421_v20 = vpop.permute.xlu1 %420 }
  0xb0   : > { %v328_v33 = vrot.slane %v327_v29, 1  ;;  %v349_v34 = vrot.slane %v348_v30, 1  ;;  %v334_v35 = vrot.slane %v333_v31, 1  ;;  %v355_v36 = vrot.slane %v354_v32, 1 }
  0xb2   : > { %v329_v38 = vadd.f32 %v328_v33, %v327_v29  ;;  %v350_v39 = vmax.f32 %v348_v30, %v349_v34  ;;  %v335_v40 = vadd.f32 %v334_v35, %v333_v31  ;;  %v356_v41 = vmax.f32 %v354_v32, %v355_v36 }
  0xb4   : > { %v343_v44 = vmul.f32 %v342_v37, %v329_v38  ;;  %v344_v45 = vmul.f32 %v342_v37, %v335_v40  ;;  %v363_v47 = vmul.f32 %v362_v43, %v350_v39  ;;  %v364_v49 = vmul.f32 %v362_v43, %v356_v41 }
  0xb6   : > { %v359_v46 = vmul.f32 %v358_v42, %v343_v44  ;;  %v360_v48 = vmul.f32 %v358_v42, %v344_v45 }
  0xb8   : > { %v365_v50 = vadd.f32 %v363_v47, %v359_v46  ;;  %v366_v51 = vadd.f32 %v364_v49, %v360_v48 }
  0xba   : > { %v615_v52 = vmul.f32 -1.442695, %v365_v50  ;;  %v616_v53 = vmul.f32 -1.442695, %v366_v51 }
  0xbc   : > { %687 = vpow2.f32 %v615_v52 }
  0xbd   : > { %689 = vpow2.f32 %v616_v53 }
  0xc2   : > { %v688_v54 = vpop.eup %687 }
  0xc3   : > { %v690_v55 = vpop.eup %689  ;;  %v373_v56 = vadd.f32 1.0, %v688_v54 }
  0xc4   : > { %v374_v57 = vadd.f32 1.0, %v690_v55 }
  0xc5   : > { %691 = vrcp.f32 %v373_v56  ;;  %v386_v63 = vand.u32 2147483648, %v373_v56  ;;  %v384_v2 = vand.u32 2147483647, %v373_v56  ;;  %vm380_vm5 = vweird.f32 %v373_v56 }
  0xc6   : > { %693 = vrcp.f32 %v374_v57  ;;  %v401_v3 = vand.u32 2147483648, %v374_v57  ;;  %v399_v5 = vand.u32 2147483647, %v374_v57  ;;  %vm395_vm7 = vweird.f32 %v374_v57 }
  0xc7   : > { %v387_v7 = vor.u32 1.1754944e-38, %v386_v63  ;;  %vm385_vm8 = vcmp.eq.f32.partialorder %v384_v2, 8.507059e+37 }
  0xc8   : > { %v402_v10 = vor.u32 1.1754944e-38, %v401_v3  ;;  %vm400_vm10 = vcmp.eq.f32.partialorder %v399_v5, 8.507059e+37 }
  0xcb   : > { %v692_v58 = vpop.eup %691 }
  0xcc   : > { %v694_v59 = vpop.eup %693  ;;  %v376_v60 = vmul.f32 %v692_v58, %v373_v56  ;;  %vm381_vm3 = vweird.f32 %v692_v58 }
  0xcd   : > { %v391_v61 = vmul.f32 %v694_v59, %v374_v57  ;;  %vm396_vm4 = vweird.f32 %v694_v59  ;;  %vm382_vm6 = vmor %vm380_vm5, %vm381_vm3 }
  0xce   : > { %v377_v62 = vsub.f32 1.0, %v376_v60  ;;  %vm397_vm9 = vmor %vm395_vm7, %vm396_vm4 }
  0xcf   : > { %v392_v0 = vsub.f32 1.0, %v391_v61 }
  0xd0   : > { %v378_v1 = vmul.f32 %v692_v58, %v377_v62 }
  0xd1   : > { %v393_v4 = vmul.f32 %v694_v59, %v392_v0 }
  0xd2   : > { %v379_v6 = vadd.f32 %v692_v58, %v378_v1 }
  0xd3   : > { %v394_v8 = vadd.f32 %v694_v59, %v393_v4 }
  0xd4   : > { %v383_v9 = vsel %vm382_vm6, %v692_v58, %v379_v6 }
  0xd5   : > { %v388_v11 = vsel %vm385_vm8, %v387_v7, %v383_v9  ;;  %v398_v12 = vsel %vm397_vm9, %v694_v59, %v394_v8 }
  0xd6   : > { %v403_v13 = vsel %vm400_vm10, %v402_v10, %v398_v12  ;;  %v405_v14 = vadd.f32 1.0, %v388_v11 }
  0xd7   : > { %v406_v17 = vadd.f32 1.0, %v403_v13 }
  0xd8   : > { %v407_v18 = vmul.f32 %v405_v14, %v911_v15 }
  0xd9   : > { %v408_v21 = vmul.f32 %v406_v17, %v913_v16 }
  0xda   : > { %v415_v22 = vmul.f32 %v413_v19, %v407_v18 }
  0xdb   : > { %v416_v23 = vmul.f32 %v413_v19, %v408_v21  ;;  %v800_v19 = vmov -1.0  }
  0xdc   : > { %v923_v24 = vadd.f32 %v421_v20, %v415_v22 }
  0xdd   : > { %v925_v25 = vadd.f32 %v421_v20, %v416_v23 }
  0xde   : > { %v928_v26 = vmul.f32 0.70710677, %v923_v24 }
  0xdf   : > { %v931_v27 = vmul.f32 0.70710677, %v925_v25 }
  0xe0   : > { %v433_v28 = vand.u32 2147483647, %v928_v26  ;;  %vm429_vm3 = vcmp.ge.f32.partialorder %v928_v26, 0.0  ;;  %v425_v26 = vmul.f32 0.5, %v923_v24 }
  0xe1   : > { %v434_v15 = vand.u32 2147483647, %v931_v27  ;;  %vm430_vm4 = vcmp.ge.f32.partialorder %v931_v27, 0.0  ;;  %v431_v20 = vsel %vm429_vm3, 1.0, %v800_v19  ;;  %v426_v27 = vmul.f32 0.5, %v925_v25 }
  0xe2   : > { %v435_v29 = vmul.f32 0.3275911, %v433_v28  ;;  %v487_v51 = vsub.f32 0.0, %v433_v28  ;;  %v432_v22 = vsel %vm430_vm4, 1.0, %v800_v19 }
  0xe3   : > { %v436_v30 = vmul.f32 0.3275911, %v434_v15  ;;  %v488_v54 = vsub.f32 0.0, %v434_v15 }
  0xe4   : > { %v437_v31 = vadd.f32 1.0, %v435_v29  ;;  %v489_v58 = vmul.f32 %v487_v51, %v433_v28 }
  0xe5   : > { %v438_v16 = vadd.f32 1.0, %v436_v30  ;;  %v490_v60 = vmul.f32 %v488_v54, %v434_v15 }
  0xe6   : > { %695 = vrcp.f32 %v437_v31  ;;  %v450_v37 = vand.u32 2147483648, %v437_v31  ;;  %v448_v40 = vand.u32 2147483647, %v437_v31  ;;  %vm444_vm13 = vweird.f32 %v437_v31 }
  0xe7   : > { %697 = vrcp.f32 %v438_v16  ;;  %v465_v41 = vand.u32 2147483648, %v438_v16  ;;  %v463_v43 = vand.u32 2147483647, %v438_v16  ;;  %vm459_vm15 = vweird.f32 %v438_v16 }
  0xe8   : > { %v451_v45 = vor.u32 1.1754944e-38, %v450_v37  ;;  %vm449_vm0 = vcmp.eq.f32.partialorder %v448_v40, 8.507059e+37  ;;  %v491_v0 = vmul.f32 1.442695, %v489_v58  ;;  %v493_v2 = vmul.f32 1.442695, %v490_v60 }
  0xe9   : > { %v466_v48 = vor.u32 1.1754944e-38, %v465_v41  ;;  %vm464_vm2 = vcmp.eq.f32.partialorder %v463_v43, 8.507059e+37 }
  0xea   : > { %699 = vpow2.f32 %v491_v0 }
  0xeb   : > { %701 = vpow2.f32 %v493_v2 }
  0xec   : > { %v696_v32 = vpop.eup %695 }
  0xed   : > { %v698_v33 = vpop.eup %697  ;;  %v440_v34 = vmul.f32 %v696_v32, %v437_v31  ;;  %vm445_vm11 = vweird.f32 %v696_v32 }
  0xee   : > { %v455_v35 = vmul.f32 %v698_v33, %v438_v16  ;;  %vm460_vm12 = vweird.f32 %v698_v33  ;;  %vm446_vm14 = vmor %vm444_vm13, %vm445_vm11 }
  0xef   : > { %v441_v36 = vsub.f32 1.0, %v440_v34  ;;  %vm461_vm1 = vmor %vm459_vm15, %vm460_vm12 }
  0xf0   : > { %v456_v38 = vsub.f32 1.0, %v455_v35  ;;  %v700_v11 = vpop.eup %699 }
  0xf1   : > { %v442_v39 = vmul.f32 %v696_v32, %v441_v36  ;;  %v702_v13 = vpop.eup %701 }
  0xf2   : > { %v457_v42 = vmul.f32 %v698_v33, %v456_v38 }
  0xf3   : > { %v443_v44 = vadd.f32 %v696_v32, %v442_v39 }
  0xf4   : > { %v458_v46 = vadd.f32 %v698_v33, %v457_v42 }
  0xf5   : > { %v447_v47 = vsel %vm446_vm14, %v696_v32, %v443_v44 }
  0xf6   : > { %v452_v49 = vsel %vm449_vm0, %v451_v45, %v447_v47  ;;  %v462_v50 = vsel %vm461_vm1, %v698_v33, %v458_v46 }
  0xf7   : > { %v467_v52 = vsel %vm464_vm2, %v466_v48, %v462_v50  ;;  %v469_v53 = vmul.f32 1.0614054, %v452_v49 }
  0xf8   : > { %v470_v55 = vmul.f32 1.0614054, %v467_v52 }
  0xf9   : > { %v471_v56 = vadd.f32 -1.4531521, %v469_v53 }
  0xfa   : > { %v472_v57 = vadd.f32 -1.4531521, %v470_v55 }
  0xfb   : > { %v473_v59 = vmul.f32 %v471_v56, %v452_v49 }
  0xfc   : > { %v474_v61 = vmul.f32 %v472_v57, %v467_v52 }
  0xfd   : > { %v475_v62 = vadd.f32 1.4214138, %v473_v59 }
  0xfe   : > { %v476_v63 = vadd.f32 1.4214138, %v474_v61 }
  0xff   : > { %v477_v1 = vmul.f32 %v475_v62, %v452_v49 }
 0x100   : > { %v478_v3 = vmul.f32 %v476_v63, %v467_v52 }
 0x101   : > { %v479_v4 = vadd.f32 -0.28449672, %v477_v1 }
 0x102   : > { %v480_v5 = vadd.f32 -0.28449672, %v478_v3 }
 0x103   : > { %v481_v6 = vmul.f32 %v479_v4, %v452_v49 }
 0x104   : > { %v482_v7 = vmul.f32 %v480_v5, %v467_v52 }
 0x105   : > { %v483_v8 = vadd.f32 0.2548296, %v481_v6 }
 0x106   : > { %v484_v9 = vadd.f32 0.2548296, %v482_v7 }
 0x107   : > { %v485_v10 = vmul.f32 %v483_v8, %v452_v49 }
 0x108   : > { %v486_v12 = vmul.f32 %v484_v9, %v467_v52 }
 0x109   : > { %v495_v14 = vmul.f32 %v700_v11, %v485_v10 }
 0x10a   : > { %v496_v17 = vmul.f32 %v702_v13, %v486_v12 }
 0x10b   : > { %v497_v18 = vsub.f32 1.0, %v495_v14 }
 0x10c   : > { %v498_v21 = vsub.f32 1.0, %v496_v17 }
 0x10d   : > { %v499_v23 = vmul.f32 %v497_v18, %v431_v20 }
 0x10e   : > { %v500_v28 = vmul.f32 %v498_v21, %v432_v22 }
 0x10f   : > { %v501_v15 = vadd.f32 1.0, %v499_v23 }
 0x110   : > { %v502_v29 = vadd.f32 1.0, %v500_v28 }
 0x111   : > { %v503_v30 = vmul.f32 %v501_v15, %v425_v26 }
 0x112   : > { %v504_v31 = vmul.f32 %v502_v29, %v426_v27 }
 0x113   : > { %505 = vst [vmem:[%s251_s20] sm:$0xff] %v503_v30 }
 0x114   : > { %506 = vst [vmem:[%s251_s20 + $0x8] sm:$0xff] %v504_v31 }
 0x115   : > { %742 = shalt.err (!%p739_p5)
}
 0x116   : > { %624 = dma.vmem_to_hbm [thread:$0]  (%p879_p4), %s524_s28, 256, %s526_s21, %s508_s22  }
 0x117 PF: > { %p630_p6 = scmp.ge.s32.totalorder %s795_s30, 2  ;;  %s537_s14 = sand.u32 1, %s775_s25  }
 0x118   : > { %s538_s16 = scalar_lea.sflag [#allocation5], %s537_s14 }
 0x119   : > { %p627_p7 = pnand %p630_p6, %p886_p8 }
 0x11b   : > { %p628_p9 = pneg %p627_p7 }
 0x11d   : > { %770 = dma.done.wait (%p628_p9), %s538_s16, 256  }
 0x11e   : > { %772 = vsyncadd (%p628_p9), %s538_s16, 4294967040  ;;  %s27_s30 = sadd.s32 1, %s795_s30   ;;  %s989_s25 = smov %s779_s26 }
 0x11f   : > { %p24_p10 = scmp.ge.s32.totalorder %s27_s30, 4   ;;  %s990_s26 = smov %s783_s27 }
 0x120   : > { %s991_s27 = smov %s892_s13  ;;  %s992_s28 = smov %s791_s29 }
 0x121   : > { %s993_s29 = smov %s995_s8  ;;  %26 = sbr.rel (!%p24_p10) target bundleno = 10 (0xa), region = 75 }
 0x126   :  { %544 = vsyncpa [#allocation5], 1 }
 0x127   :  { %546 = vsyncpa [#allocation5 + $0x1], 1 }

</bundles_post_ra>
